<compile_context>
chip_gen: v5e
topology: v5e:2x2
jax: 0.10.0
libtpu: 0.0.40
codegen_flags: <defaults>
</compile_context>

<pallas_src>
import functools

import jax
import jax.numpy as jnp
from jax.experimental import pallas as pl
from jax.experimental.pallas import tpu as pltpu


def _round_up(x, m):
    return ((x + m - 1) // m) * m


def _discriminator_kernel(x_ref,
                          w1_ref, b1_ref,
                          w2_ref, b2_ref,
                          w3_ref, b3_ref,
                          w4_ref, b4_ref,
                          w5_ref, b5_ref,
                          o_ref):
    """Fused 5-layer MLP forward on one batch tile.

    Matmul inputs use the weights' dtype (f32 or bf16); accumulation, bias-add,
    ReLU and sigmoid stay in f32 (VPU/EUP).  The final H->1 projection is a
    lane reduction rather than a 1-wide MXU matmul.
    """
    cd = w1_ref.dtype  # matmul-input dtype (f32 or bf16)

    # Linear 1 + ReLU
    h = jnp.dot(x_ref[...].astype(cd), w1_ref[...],
                preferred_element_type=jnp.float32)
    h = jnp.maximum(h + b1_ref[...], 0.0)
    # Linear 2 + ReLU
    h = jnp.dot(h.astype(cd), w2_ref[...], preferred_element_type=jnp.float32)
    h = jnp.maximum(h + b2_ref[...], 0.0)
    # Linear 3 + ReLU
    h = jnp.dot(h.astype(cd), w3_ref[...], preferred_element_type=jnp.float32)
    h = jnp.maximum(h + b3_ref[...], 0.0)
    # Linear 4 + ReLU
    h = jnp.dot(h.astype(cd), w4_ref[...], preferred_element_type=jnp.float32)
    h = jnp.maximum(h + b4_ref[...], 0.0)

    # Linear 5 (H -> 1): keep it off the MXU — VPU multiply + cross-lane sum.
    logits = jnp.sum(h * w5_ref[...], axis=-1, keepdims=True) + b5_ref[...]
    # Sigmoid (exp goes to the EUP slot; overflow of exp -> inf gives 0, correct).
    o_ref[...] = (1.0 / (1.0 + jnp.exp(-logits))).astype(o_ref.dtype)


@functools.partial(jax.jit, static_argnames=("batch_tile", "compute_dtype"))
def discriminator_forward(x, params, batch_tile=256, compute_dtype=jnp.float32):
    """x: [B, n_z] float32.  params: dict of f32 weights/biases.  Returns [B, 1] f32.

    compute_dtype selects the matmul-input dtype (jnp.float32 or jnp.bfloat16);
    accumulation and all elementwise math remain f32.
    """
    B, n_z = x.shape
    H = params["w1"].shape[1]  # dim_h * 4

    # ---- batch tile selection ------------------------------------------------
    # Big tiles fill the MXU (128 rows on v5e, 256 on v6e/v7x) and amortise the
    # ~0.35us/step grid overhead.  If the whole batch fits in one step but is
    # large (>=256 rows), split it so the "parallel" axis has >=2 steps and can
    # shard across both v7x TensorCores.
    tb = min(batch_tile, B)
    if B >= 256 and pl.cdiv(B, tb) < 2:
        tb = max(128, _round_up(pl.cdiv(B, 2), 8))
    grid = (pl.cdiv(B, tb),)

    # ---- parameter staging ---------------------------------------------------
    w1 = params["w1"].astype(compute_dtype)
    w2 = params["w2"].astype(compute_dtype)
    w3 = params["w3"].astype(compute_dtype)
    w4 = params["w4"].astype(compute_dtype)
    # Layer-5 weight passed as an f32 (1, H) row for the in-kernel lane reduce.
    w5_row = params["w5"].reshape(1, H).astype(jnp.float32)
    b1 = params["b1"].astype(jnp.float32)
    b2 = params["b2"].astype(jnp.float32)
    b3 = params["b3"].astype(jnp.float32)
    b4 = params["b4"].astype(jnp.float32)
    b5 = params["b5"].astype(jnp.float32)

    # ---- BlockSpecs ------------------------------------------------------------
    xmap = lambda i: (i, 0)       # batch-tiled
    wmap = lambda i: (0, 0)       # broadcast (same block every grid step)
    full = lambda shape: pl.BlockSpec(shape, wmap)

    in_specs = [
        pl.BlockSpec((tb, n_z), xmap),          # x tile
        full((n_z, H)), full((1, H)),           # layer 1
        full((H, H)),   full((1, H)),           # layer 2
        full((H, H)),   full((1, H)),           # layer 3
        full((H, H)),   full((1, H)),           # layer 4
        full((1, H)),   full((1, 1)),           # layer 5 (row vector + bias)
    ]
    out_spec = pl.BlockSpec((tb, 1), xmap)

    # ---- cost estimate / compiler params --------------------------------------
    wbytes = jnp.dtype(compute_dtype).itemsize
    flops = 2 * B * (n_z * H + 3 * H * H + H)
    bytes_accessed = (
        x.size * x.dtype.itemsize                 # x
        + B * 4                                   # output
        + (n_z * H + 3 * H * H) * wbytes          # matmul weights
        + (H + 4 * H + 1) * 4                     # w5 row + biases (f32)
    )
    cost = pl.CostEstimate(flops=flops, transcendentals=B,
                           bytes_accessed=bytes_accessed)

    compiler_params = pltpu.CompilerParams(
        dimension_semantics=("parallel",),
        # Headroom above the 16/32 MiB scoped defaults, below v7x's 64 MiB physical.
        vmem_limit_bytes=48 * 1024 * 1024,
    )

    return pl.pallas_call(
        _discriminator_kernel,
        out_shape=jax.ShapeDtypeStruct((B, 1), jnp.float32),
        grid_spec=pltpu.PrefetchScalarGridSpec(
            num_scalar_prefetch=0,
            grid=grid,
            in_specs=in_specs,
            out_specs=out_spec,
        ),
        compiler_params=compiler_params,
        cost_estimate=cost,
    )(x, w1, b1, w2, b2, w3, b3, w4, b4, w5_row, b5)


def init_params(key, n_z, dim_h):
    """Deterministic init mimicking torch.nn.Linear default (U[-1/sqrt(fan_in), +...])."""
    H = dim_h * 4
    sizes = [(n_z, H), (H, H), (H, H), (H, H), (H, 1)]
    params = {}
    keys = jax.random.split(key, 2 * len(sizes))
    for idx, (fan_in, fan_out) in enumerate(sizes):
        bound = 1.0 / jnp.sqrt(jnp.float32(fan_in))
        w = jax.random.uniform(keys[2 * idx], (fan_in, fan_out),
                               jnp.float32, -bound, bound)
        b = jax.random.uniform(keys[2 * idx + 1], (1, fan_out),
                               jnp.float32, -bound, bound)
        params[f"w{idx + 1}"] = w
        params[f"b{idx + 1}"] = b
    return params


def reference_forward(x, params):
    h = x
    for i in range(1, 5):
        h = jnp.maximum(h @ params[f"w{i}"] + params[f"b{i}"], 0.0)
    logits = h @ params["w5"] + params["b5"]
    return jax.nn.sigmoid(logits)


if __name__ == "__main__":
    # Small shapes consistent with the module: hp.n_z=16, hp.dim_h=32 -> hidden=128.
    B, N_Z, DIM_H = 8, 16, 32

    key = jax.random.PRNGKey(0)
    k_x, k_p, k_x2 = jax.random.split(key, 3)
    x = jax.random.normal(k_x, (B, N_Z), jnp.float32)
    params = init_params(k_p, N_Z, DIM_H)

    # f32 path, tiny batch (single grid step).
    out = jax.block_until_ready(discriminator_forward(x, params))
    ref = reference_forward(x, params)
    assert out.shape == (B, 1), out.shape
    assert jnp.allclose(out, ref, atol=1e-5, rtol=1e-5), "f32 small-batch mismatch"

    # Larger batch exercises multi-step batch tiling (grid of >=2 parallel steps).
    B2 = 512
    x2 = jax.random.normal(k_x2, (B2, N_Z), jnp.float32)
    out2 = jax.block_until_ready(
        discriminator_forward(x2, params, batch_tile=256))
    ref2 = reference_forward(x2, params)
    assert out2.shape == (B2, 1), out2.shape
    assert jnp.allclose(out2, ref2, atol=1e-5, rtol=1e-5), "f32 tiled mismatch"

    # bf16 matmul-input path (v6e/v7x fast path): f32 accumulation, looser tol.
    out_bf16 = jax.block_until_ready(
        discriminator_forward(x2, params, batch_tile=256,
                              compute_dtype=jnp.bfloat16))
    assert jnp.allclose(out_bf16, ref2, atol=2e-2, rtol=2e-2), "bf16 path mismatch"

    print("KERNEL_OK")
</pallas_src>

<mosaic_0001>
module attributes {stable_mosaic.version = 11 : i64} {
  func.func @_discriminator_kernel(%arg0: i32, %arg1: memref<8x16xf32, #tpu.memory_space<vmem>>, %arg2: memref<16x128xf32, #tpu.memory_space<vmem>>, %arg3: memref<1x128xf32, #tpu.memory_space<vmem>>, %arg4: memref<128x128xf32, #tpu.memory_space<vmem>>, %arg5: memref<1x128xf32, #tpu.memory_space<vmem>>, %arg6: memref<128x128xf32, #tpu.memory_space<vmem>>, %arg7: memref<1x128xf32, #tpu.memory_space<vmem>>, %arg8: memref<128x128xf32, #tpu.memory_space<vmem>>, %arg9: memref<1x128xf32, #tpu.memory_space<vmem>>, %arg10: memref<1x128xf32, #tpu.memory_space<vmem>>, %arg11: memref<1x1xf32, #tpu.memory_space<vmem>>, %arg12: memref<8x1xf32, #tpu.memory_space<vmem>>) attributes {dimension_semantics = [#tpu.dimension_semantics<parallel>], iteration_bounds = array<i64: 1>, scalar_prefetch = 0 : i64, scratch_operands = 0 : i64, tpu.core_type = #tpu.core_type<tc>, window_params = [{transform_indices = @transform_0, window_bounds = array<i64: 8, 16>}, {pipeline_mode = #tpu.pipeline_mode<synchronous>, transform_indices = @transform_1, window_bounds = array<i64: 16, 128>}, {pipeline_mode = #tpu.pipeline_mode<synchronous>, transform_indices = @transform_2, window_bounds = array<i64: 1, 128>}, {pipeline_mode = #tpu.pipeline_mode<synchronous>, transform_indices = @transform_3, window_bounds = array<i64: 128, 128>}, {pipeline_mode = #tpu.pipeline_mode<synchronous>, transform_indices = @transform_4, window_bounds = array<i64: 1, 128>}, {pipeline_mode = #tpu.pipeline_mode<synchronous>, transform_indices = @transform_5, window_bounds = array<i64: 128, 128>}, {pipeline_mode = #tpu.pipeline_mode<synchronous>, transform_indices = @transform_6, window_bounds = array<i64: 1, 128>}, {pipeline_mode = #tpu.pipeline_mode<synchronous>, transform_indices = @transform_7, window_bounds = array<i64: 128, 128>}, {pipeline_mode = #tpu.pipeline_mode<synchronous>, transform_indices = @transform_8, window_bounds = array<i64: 1, 128>}, {pipeline_mode = #tpu.pipeline_mode<synchronous>, transform_indices = @transform_9, window_bounds = array<i64: 1, 128>}, {pipeline_mode = #tpu.pipeline_mode<synchronous>, transform_indices = @transform_10, window_bounds = array<i64: 1, 1>}, {transform_indices = @transform_11, window_bounds = array<i64: 8, 1>}]} {
    %c0 = arith.constant 0 : index
    %c0_0 = arith.constant 0 : index
    %0 = vector.load %arg1[%c0, %c0_0] : memref<8x16xf32, #tpu.memory_space<vmem>>, vector<8x16xf32>
    %c0_1 = arith.constant 0 : index
    %c0_2 = arith.constant 0 : index
    %1 = vector.load %arg2[%c0_1, %c0_2] : memref<16x128xf32, #tpu.memory_space<vmem>>, vector<16x128xf32>
    %cst = arith.constant dense<0.000000e+00> : vector<8x128xf32>
    %2 = tpu.matmul %0, %1, %cst {dimension_numbers = #tpu.dot_dimension_numbers<[1], [0], [0], [1], [0, 0, 1, 1], [], []>} : vector<8x16xf32>, vector<16x128xf32>, vector<8x128xf32> -> vector<8x128xf32>
    %c0_3 = arith.constant 0 : index
    %c0_4 = arith.constant 0 : index
    %3 = vector.load %arg3[%c0_3, %c0_4] : memref<1x128xf32, #tpu.memory_space<vmem>>, vector<1x128xf32>
    %4 = vector.broadcast %3 : vector<1x128xf32> to vector<8x128xf32>
    %5 = arith.addf %2, %4 : vector<8x128xf32>
    %cst_5 = arith.constant 0.000000e+00 : f32
    %6 = vector.broadcast %cst_5 : f32 to vector<8x128xf32>
    %7 = arith.maximumf %5, %6 : vector<8x128xf32>
    %c0_6 = arith.constant 0 : index
    %c0_7 = arith.constant 0 : index
    %8 = vector.load %arg4[%c0_6, %c0_7] : memref<128x128xf32, #tpu.memory_space<vmem>>, vector<128x128xf32>
    %cst_8 = arith.constant dense<0.000000e+00> : vector<8x128xf32>
    %9 = tpu.matmul %7, %8, %cst_8 {dimension_numbers = #tpu.dot_dimension_numbers<[1], [0], [0], [1], [0, 0, 1, 1], [], []>} : vector<8x128xf32>, vector<128x128xf32>, vector<8x128xf32> -> vector<8x128xf32>
    %c0_9 = arith.constant 0 : index
    %c0_10 = arith.constant 0 : index
    %10 = vector.load %arg5[%c0_9, %c0_10] : memref<1x128xf32, #tpu.memory_space<vmem>>, vector<1x128xf32>
    %11 = vector.broadcast %10 : vector<1x128xf32> to vector<8x128xf32>
    %12 = arith.addf %9, %11 : vector<8x128xf32>
    %cst_11 = arith.constant 0.000000e+00 : f32
    %13 = vector.broadcast %cst_11 : f32 to vector<8x128xf32>
    %14 = arith.maximumf %12, %13 : vector<8x128xf32>
    %c0_12 = arith.constant 0 : index
    %c0_13 = arith.constant 0 : index
    %15 = vector.load %arg6[%c0_12, %c0_13] : memref<128x128xf32, #tpu.memory_space<vmem>>, vector<128x128xf32>
    %cst_14 = arith.constant dense<0.000000e+00> : vector<8x128xf32>
    %16 = tpu.matmul %14, %15, %cst_14 {dimension_numbers = #tpu.dot_dimension_numbers<[1], [0], [0], [1], [0, 0, 1, 1], [], []>} : vector<8x128xf32>, vector<128x128xf32>, vector<8x128xf32> -> vector<8x128xf32>
    %c0_15 = arith.constant 0 : index
    %c0_16 = arith.constant 0 : index
    %17 = vector.load %arg7[%c0_15, %c0_16] : memref<1x128xf32, #tpu.memory_space<vmem>>, vector<1x128xf32>
    %18 = vector.broadcast %17 : vector<1x128xf32> to vector<8x128xf32>
    %19 = arith.addf %16, %18 : vector<8x128xf32>
    %cst_17 = arith.constant 0.000000e+00 : f32
    %20 = vector.broadcast %cst_17 : f32 to vector<8x128xf32>
    %21 = arith.maximumf %19, %20 : vector<8x128xf32>
    %c0_18 = arith.constant 0 : index
    %c0_19 = arith.constant 0 : index
    %22 = vector.load %arg8[%c0_18, %c0_19] : memref<128x128xf32, #tpu.memory_space<vmem>>, vector<128x128xf32>
    %cst_20 = arith.constant dense<0.000000e+00> : vector<8x128xf32>
    %23 = tpu.matmul %21, %22, %cst_20 {dimension_numbers = #tpu.dot_dimension_numbers<[1], [0], [0], [1], [0, 0, 1, 1], [], []>} : vector<8x128xf32>, vector<128x128xf32>, vector<8x128xf32> -> vector<8x128xf32>
    %c0_21 = arith.constant 0 : index
    %c0_22 = arith.constant 0 : index
    %24 = vector.load %arg9[%c0_21, %c0_22] : memref<1x128xf32, #tpu.memory_space<vmem>>, vector<1x128xf32>
    %25 = vector.broadcast %24 : vector<1x128xf32> to vector<8x128xf32>
    %26 = arith.addf %23, %25 : vector<8x128xf32>
    %cst_23 = arith.constant 0.000000e+00 : f32
    %27 = vector.broadcast %cst_23 : f32 to vector<8x128xf32>
    %28 = arith.maximumf %26, %27 : vector<8x128xf32>
    %c0_24 = arith.constant 0 : index
    %c0_25 = arith.constant 0 : index
    %29 = vector.load %arg10[%c0_24, %c0_25] : memref<1x128xf32, #tpu.memory_space<vmem>>, vector<1x128xf32>
    %30 = vector.broadcast %29 : vector<1x128xf32> to vector<8x128xf32>
    %31 = arith.mulf %28, %30 : vector<8x128xf32>
    %cst_26 = arith.constant dense<0.000000e+00> : vector<8xf32>
    %32 = vector.multi_reduction <add>, %31, %cst_26 [1] : vector<8x128xf32> to vector<8xf32>
    %33 = vector.shape_cast %32 : vector<8xf32> to vector<8x1xf32>
    %c0_27 = arith.constant 0 : index
    %c0_28 = arith.constant 0 : index
    %34 = vector.load %arg11[%c0_27, %c0_28] : memref<1x1xf32, #tpu.memory_space<vmem>>, vector<1x1xf32>
    %35 = vector.broadcast %34 : vector<1x1xf32> to vector<8x1xf32>
    %36 = arith.addf %33, %35 : vector<8x1xf32>
    %cst_29 = arith.constant 0.000000e+00 : f32
    %37 = vector.broadcast %cst_29 : f32 to vector<8x1xf32>
    %38 = arith.subf %37, %36 : vector<8x1xf32>
    %39 = math.exp %38 : vector<8x1xf32>
    %cst_30 = arith.constant 1.000000e+00 : f32
    %40 = vector.broadcast %cst_30 : f32 to vector<8x1xf32>
    %41 = arith.addf %40, %39 : vector<8x1xf32>
    %cst_31 = arith.constant 1.000000e+00 : f32
    %42 = vector.broadcast %cst_31 : f32 to vector<8x1xf32>
    %43 = arith.divf %42, %41 : vector<8x1xf32>
    %c0_32 = arith.constant 0 : index
    %c0_33 = arith.constant 0 : index
    %44 = vector.load %arg12[%c0_32, %c0_33] : memref<8x1xf32, #tpu.memory_space<vmem>>, vector<8x1xf32>
    tpu.vector_store %arg12[%c0_32, %c0_33], %43 {strides = array<i32>} : memref<8x1xf32, #tpu.memory_space<vmem>>, vector<8x1xf32>,
    return
  }
  func.func @transform_0(%arg0: i32) -> (i32, i32) {
    %c0_i32 = arith.constant 0 : i32
    %c0_i32_0 = arith.constant 0 : i32
    return %arg0, %c0_i32 : i32, i32
  }
  func.func @transform_1(%arg0: i32) -> (i32, i32) {
    %c0_i32 = arith.constant 0 : i32
    %c0_i32_0 = arith.constant 0 : i32
    %c0_i32_1 = arith.constant 0 : i32
    return %c0_i32, %c0_i32_0 : i32, i32
  }
  func.func @transform_2(%arg0: i32) -> (i32, i32) {
    %c0_i32 = arith.constant 0 : i32
    %c0_i32_0 = arith.constant 0 : i32
    %c0_i32_1 = arith.constant 0 : i32
    return %c0_i32, %c0_i32_0 : i32, i32
  }
  func.func @transform_3(%arg0: i32) -> (i32, i32) {
    %c0_i32 = arith.constant 0 : i32
    %c0_i32_0 = arith.constant 0 : i32
    %c0_i32_1 = arith.constant 0 : i32
    return %c0_i32, %c0_i32_0 : i32, i32
  }
  func.func @transform_4(%arg0: i32) -> (i32, i32) {
    %c0_i32 = arith.constant 0 : i32
    %c0_i32_0 = arith.constant 0 : i32
    %c0_i32_1 = arith.constant 0 : i32
    return %c0_i32, %c0_i32_0 : i32, i32
  }
  func.func @transform_5(%arg0: i32) -> (i32, i32) {
    %c0_i32 = arith.constant 0 : i32
    %c0_i32_0 = arith.constant 0 : i32
    %c0_i32_1 = arith.constant 0 : i32
    return %c0_i32, %c0_i32_0 : i32, i32
  }
  func.func @transform_6(%arg0: i32) -> (i32, i32) {
    %c0_i32 = arith.constant 0 : i32
    %c0_i32_0 = arith.constant 0 : i32
    %c0_i32_1 = arith.constant 0 : i32
    return %c0_i32, %c0_i32_0 : i32, i32
  }
  func.func @transform_7(%arg0: i32) -> (i32, i32) {
    %c0_i32 = arith.constant 0 : i32
    %c0_i32_0 = arith.constant 0 : i32
    %c0_i32_1 = arith.constant 0 : i32
    return %c0_i32, %c0_i32_0 : i32, i32
  }
  func.func @transform_8(%arg0: i32) -> (i32, i32) {
    %c0_i32 = arith.constant 0 : i32
    %c0_i32_0 = arith.constant 0 : i32
    %c0_i32_1 = arith.constant 0 : i32
    return %c0_i32, %c0_i32_0 : i32, i32
  }
  func.func @transform_9(%arg0: i32) -> (i32, i32) {
    %c0_i32 = arith.constant 0 : i32
    %c0_i32_0 = arith.constant 0 : i32
    %c0_i32_1 = arith.constant 0 : i32
    return %c0_i32, %c0_i32_0 : i32, i32
  }
  func.func @transform_10(%arg0: i32) -> (i32, i32) {
    %c0_i32 = arith.constant 0 : i32
    %c0_i32_0 = arith.constant 0 : i32
    %c0_i32_1 = arith.constant 0 : i32
    return %c0_i32, %c0_i32_0 : i32, i32
  }
  func.func @transform_11(%arg0: i32) -> (i32, i32) {
    %c0_i32 = arith.constant 0 : i32
    %c0_i32_0 = arith.constant 0 : i32
    return %arg0, %c0_i32 : i32, i32
  }
}

</mosaic_0001>

<bundles_post_ra>
// kernel: discriminator_forward.1
= control target key start
LH: loop header
LB: loop body
LE: loop exit
PB: predicated region body
PF: predicated region fallthrough
CT: control target
= control target key end

     0   :  { %s558_s0 = inlined_call_operand.hbm [shape: f32[8,16], index: 0, kind: input, shape index: {}]   ;;  %s559_s1 = inlined_call_operand.hbm [shape: f32[16,128], index: 1, kind: input, shape index: {}]   ;;  %s560_s2 = inlined_call_operand.vmem [shape: f32[1,128], index: 2, kind: input, shape index: {}]   ;;  %s561_s3 = inlined_call_operand.hbm [shape: f32[128,128], index: 3, kind: input, shape index: {}]   ;;  %s562_s4 = inlined_call_operand.vmem [shape: f32[1,128], index: 4, kind: input, shape index: {}]   ;;  %s563_s5 = inlined_call_operand.hbm [shape: f32[128,128], index: 5, kind: input, shape index: {}]   ;;  %s564_s6 = inlined_call_operand.vmem [shape: f32[1,128], index: 6, kind: input, shape index: {}]   ;;  %s565_s7 = inlined_call_operand.hbm [shape: f32[128,128], index: 7, kind: input, shape index: {}]   ;;  %s566_s8 = inlined_call_operand.vmem [shape: f32[1,128], index: 8, kind: input, shape index: {}]   ;;  %s567_s9 = inlined_call_operand.vmem [shape: f32[1,128], index: 9, kind: input, shape index: {}]   ;;  %s568_s10 = inlined_call_operand.<no memory space> [shape: f32[1,1], index: 10, kind: input, shape index: {}]   ;;  %s569_s11 = inlined_call_operand.vmem [shape: f32[8,1], index: 11, kind: output, shape index: {}]  }
   0x1   :  { %v16_v0 = vstv %s568_s10 }
   0x2   :  { %17 = vst [vmem:[#allocation2] sm:$0x1] %v16_v0 }
   0x3   :  { %18 = vsyncpa [#allocation4], 0 }
   0x4   :  { %19 = vsyncpa [#allocation6], 0  ;;  %s36_s21 = sshll.u32 %s559_s1, 4  ;;  %s37_s21 = int_to_ptr.hbm [resolvable:$true] %s36_s21 }
   0x5   :  { %20 = vsyncpa [#allocation9], 0  ;;  %s455_s22 = smov [#allocation5]   ;;  %s66_s26 = sshll.u32 %s563_s5, 4  ;;  %s67_s26 = int_to_ptr.hbm [resolvable:$true] %s66_s26 }
   0x6   :  { %s38_s23 = sshll.u32 %s455_s22, 4  ;;  %s456_s27 = smov 128   ;;  %s39_s23 = int_to_ptr.vmem [resolvable:$true] %s38_s23 }
   0x7   :  { %s457_s28 = smov 8   ;;  %s458_s10 = smov [#allocation8]  }
   0x8   :  { %44 = dma.hbm_to_vmem [thread:$0]  %s37_s21, 256, %s39_s23, [#allocation6], %s456_s27, %s456_s27, %s457_s28  }
   0x9   :  { %s68_s29 = sshll.u32 %s458_s10, 4  ;;  %s26_s13 = sshll.u32 %s558_s0, 4  ;;  %s69_s29 = int_to_ptr.vmem [resolvable:$true] %s68_s29  ;;  %s27_s13 = int_to_ptr.hbm [resolvable:$true] %s26_s13 }
   0xa   :  { %74 = dma.hbm_to_vmem [thread:$0]  %s67_s26, 2048, %s69_s29, [#allocation9], %s456_s27, %s456_s27, %s457_s28  }
   0xb   :  { %s51_s15 = sshll.u32 %s561_s3, 4  ;;  %s459_s16 = smov [#allocation3]   ;;  %s52_s15 = int_to_ptr.hbm [resolvable:$true] %s51_s15 }
   0xc   :  { %s28_s17 = sshll.u32 %s459_s16, 4  ;;  %s460_s5 = smov [#allocation7]   ;;  %s29_s17 = int_to_ptr.vmem [resolvable:$true] %s28_s17 }
   0xd   :  { %31 = dma.hbm_to_vmem [thread:$0]  %s27_s13, 128, %s29_s17, [#allocation4]  }
   0xe   :  { %s53_s18 = sshll.u32 %s460_s5, 4  ;;  %s81_s21 = sshll.u32 %s565_s7, 4  ;;  %s54_s18 = int_to_ptr.vmem [resolvable:$true] %s53_s18  ;;  %s82_s21 = int_to_ptr.hbm [resolvable:$true] %s81_s21 }
   0xf   :  { %59 = dma.hbm_to_vmem [thread:$0]  %s52_s15, 2048, %s54_s18, [#allocation6], %s456_s27, %s456_s27, %s457_s28  }
  0x10   :  { %s461_s0 = smov [#allocation10]  }
  0x11   :  { %s83_s22 = sshll.u32 %s461_s0, 4  ;;  %s84_s22 = int_to_ptr.vmem [resolvable:$true] %s83_s22 }
  0x12   :  { %89 = dma.hbm_to_vmem [thread:$0]  %s82_s21, 2048, %s84_s22, [#allocation9], %s456_s27, %s456_s27, %s457_s28  }
  0x13   :  { %449 = dma.done.wait [#allocation4], 128  }
  0x14   :  { %450 = vsyncadd [#allocation4], 4294967168 }
  0x15   :  { %451 = dma.done.wait [#allocation6], 2304  }
  0x16   :  { %452 = vsyncadd [#allocation6], 4294964992 }
  0x17   :  { %453 = dma.done.wait [#allocation9], 4096  }
  0x18   :  { %454 = vsyncadd [#allocation9], 4294963200  ;;  %v118_v1 = vld [vmem:[#allocation5 + $0x8] sm:$0xff]  ;;  %v117_v2 = vld [vmem:[#allocation5] sm:$0xff]  ;;  %vm123_vm0 = vcmask 130048   ;;  %vm302_vm4 = vcmask 7168  }
  0x19   :  { %141 = vmatpush.msra.mxu0 %v118_v1  ;;  %v116_v3 = vld [vmem:[#allocation3] sm:$0xff]  ;;  %v163_v4 = vld [vmem:[#allocation7 + $0x78] sm:$0xff]  ;;  %v162_v5 = vld [vmem:[#allocation7 + $0x70] sm:$0xff] }
  0x1a   :  { %168 = vmatpush.msra.mxu1 %v163_v4  ;;  %v161_v6 = vld [vmem:[#allocation7 + $0x68] sm:$0xff]  ;;  %v160_v7 = vld [vmem:[#allocation7 + $0x60] sm:$0xff]  ;;  %v159_v8 = vld [vmem:[#allocation7 + $0x58] sm:$0xff] }
  0x1b   :  { %142 = vmatpush.msra.mxu0 %v117_v2  ;;  %v158_v9 = vld [vmem:[#allocation7 + $0x50] sm:$0xff]  ;;  %v157_v10 = vld [vmem:[#allocation7 + $0x48] sm:$0xff]  ;;  %v156_v11 = vld [vmem:[#allocation7 + $0x40] sm:$0xff] }
  0x1c   :  { %311 = vmatmul.msk.f32.vlgmr.msra.gmra.mxu0 %vm123_vm0, %v116_v3  ;;  %169 = vmatpush.msra.mxu1 %v162_v5  ;;  %v155_v12 = vld [vmem:[#allocation7 + $0x38] sm:$0xff]  ;;  %v154_v13 = vld [vmem:[#allocation7 + $0x30] sm:$0xff]  ;;  %v153_v14 = vld [vmem:[#allocation7 + $0x28] sm:$0xff] }
  0x1d   :  { %v152_v15 = vld [vmem:[#allocation7 + $0x20] sm:$0xff]  ;;  %v151_v16 = vld [vmem:[#allocation7 + $0x18] sm:$0xff]  ;;  %v150_v17 = vld [vmem:[#allocation7 + $0x10] sm:$0xff] }
  0x1e   :  { %170 = vmatpush.msra.mxu1 %v161_v6  ;;  %v149_v18 = vld [vmem:[#allocation7 + $0x8] sm:$0xff]  ;;  %v148_v19 = vld [vmem:[#allocation7] sm:$0xff]  ;;  %v204_v20 = vld [vmem:[#allocation8 + $0x78] sm:$0xff] }
  0x1f   :  { %v203_v21 = vld [vmem:[#allocation8 + $0x70] sm:$0xff]  ;;  %209 = vmatpush.msra.mxu2 %v204_v20  ;;  %v202_v22 = vld [vmem:[#allocation8 + $0x68] sm:$0xff]  ;;  %v201_v23 = vld [vmem:[#allocation8 + $0x60] sm:$0xff] }
  0x20   :  { %171 = vmatpush.msra.mxu1 %v160_v7  ;;  %v200_v24 = vld [vmem:[#allocation8 + $0x58] sm:$0xff]  ;;  %v199_v25 = vld [vmem:[#allocation8 + $0x50] sm:$0xff]  ;;  %v198_v26 = vld [vmem:[#allocation8 + $0x48] sm:$0xff] }
  0x21   :  { %210 = vmatpush.msra.mxu2 %v203_v21  ;;  %v197_v27 = vld [vmem:[#allocation8 + $0x40] sm:$0xff]  ;;  %v196_v28 = vld [vmem:[#allocation8 + $0x38] sm:$0xff]  ;;  %v195_v29 = vld [vmem:[#allocation8 + $0x30] sm:$0xff] }
  0x22   :  { %172 = vmatpush.msra.mxu1 %v159_v8  ;;  %v194_v30 = vld [vmem:[#allocation8 + $0x28] sm:$0xff]  ;;  %v193_v31 = vld [vmem:[#allocation8 + $0x20] sm:$0xff]  ;;  %v192_v32 = vld [vmem:[#allocation8 + $0x18] sm:$0xff] }
  0x23   :  { %211 = vmatpush.msra.mxu2 %v202_v22  ;;  %v319_v33 = vld [vmem:[%s560_s2] ss:$0 sm:$0xff]  ;;  %v191_v37 = vld [vmem:[#allocation8 + $0x10] sm:$0xff]  ;;  %v190_v38 = vld [vmem:[#allocation8 + $0x8] sm:$0xff] }
  0x24   :  { %173 = vmatpush.msra.mxu1 %v158_v9  ;;  %v189_v39 = vld [vmem:[#allocation8] sm:$0xff]  ;;  %v245_v40 = vld [vmem:[#allocation10 + $0x78] sm:$0xff]  ;;  %v244_v41 = vld [vmem:[#allocation10 + $0x70] sm:$0xff] }
  0x25   :  { %212 = vmatpush.msra.mxu2 %v201_v23  ;;  %250 = vmatpush.msra.mxu3 %v245_v40  ;;  %v243_v42 = vld [vmem:[#allocation10 + $0x68] sm:$0xff]  ;;  %v242_v43 = vld [vmem:[#allocation10 + $0x60] sm:$0xff]  ;;  %v241_v44 = vld [vmem:[#allocation10 + $0x58] sm:$0xff] }
  0x26   :  { %174 = vmatpush.msra.mxu1 %v157_v10  ;;  %v240_v45 = vld [vmem:[#allocation10 + $0x50] sm:$0xff]  ;;  %v239_v46 = vld [vmem:[#allocation10 + $0x48] sm:$0xff]  ;;  %v238_v47 = vld [vmem:[#allocation10 + $0x40] sm:$0xff] }
  0x27   :  { %213 = vmatpush.msra.mxu2 %v200_v24  ;;  %251 = vmatpush.msra.mxu3 %v244_v41  ;;  %v237_v48 = vld [vmem:[#allocation10 + $0x38] sm:$0xff]  ;;  %v236_v49 = vld [vmem:[#allocation10 + $0x30] sm:$0xff]  ;;  %v235_v50 = vld [vmem:[#allocation10 + $0x28] sm:$0xff] }
  0x28   :  { %175 = vmatpush.msra.mxu1 %v156_v11  ;;  %v234_v51 = vld [vmem:[#allocation10 + $0x20] sm:$0xff]  ;;  %v233_v52 = vld [vmem:[#allocation10 + $0x18] sm:$0xff]  ;;  %v232_v57 = vld [vmem:[#allocation10 + $0x10] sm:$0xff] }
  0x29   :  { %214 = vmatpush.msra.mxu2 %v199_v25  ;;  %252 = vmatpush.msra.mxu3 %v243_v42  ;;  %v320_v53 = vld [vmem:[%s562_s4] ss:$0 sm:$0xff]  ;;  %v231_v58 = vld [vmem:[#allocation10 + $0x8] sm:$0xff] }
  0x2a   :  { %176 = vmatpush.msra.mxu1 %v155_v12  ;;  %v230_v59 = vld [vmem:[#allocation10] sm:$0xff] }
  0x2b   :  { %215 = vmatpush.msra.mxu2 %v198_v26  ;;  %253 = vmatpush.msra.mxu3 %v242_v43  ;;  %v321_v60 = vld [vmem:[%s564_s6] ss:$0 sm:$0xff] }
  0x2c   :  { %177 = vmatpush.msra.mxu1 %v154_v13  ;;  %v322_v0 = vld [vmem:[%s566_s8] ss:$0 sm:$0xff] }
  0x2d   :  { %216 = vmatpush.msra.mxu2 %v197_v27  ;;  %254 = vmatpush.msra.mxu3 %v241_v44  ;;  %v323_v3 = vld [vmem:[%s567_s9] ss:$0 sm:$0xff] }
  0x2e   :  { %178 = vmatpush.msra.mxu1 %v153_v14  ;;  %v324_v6 = vld [vmem:[#allocation2] ss:$0 sm:$0xff] }
  0x2f   :  { %217 = vmatpush.msra.mxu2 %v196_v28  ;;  %255 = vmatpush.msra.mxu3 %v240_v45 }
  0x30   :  { %179 = vmatpush.msra.mxu1 %v152_v15 }
  0x31   :  { %218 = vmatpush.msra.mxu2 %v195_v29  ;;  %256 = vmatpush.msra.mxu3 %v239_v46 }
  0x32   :  { %180 = vmatpush.msra.mxu1 %v151_v16 }
  0x33   :  { %219 = vmatpush.msra.mxu2 %v194_v30  ;;  %257 = vmatpush.msra.mxu3 %v238_v47 }
  0x34   :  { %181 = vmatpush.msra.mxu1 %v150_v17 }
  0x35   :  { %220 = vmatpush.msra.mxu2 %v193_v31  ;;  %258 = vmatpush.msra.mxu3 %v237_v48 }
  0x36   :  { %182 = vmatpush.msra.mxu1 %v149_v18 }
  0x37   :  { %221 = vmatpush.msra.mxu2 %v192_v32  ;;  %259 = vmatpush.msra.mxu3 %v236_v49 }
  0x38   :  { %183 = vmatpush.msra.mxu1 %v148_v19 }
  0x39   :  { %222 = vmatpush.msra.mxu2 %v191_v37  ;;  %260 = vmatpush.msra.mxu3 %v235_v50 }
  0x3b   :  { %223 = vmatpush.msra.mxu2 %v190_v38  ;;  %261 = vmatpush.msra.mxu3 %v234_v51 }
  0x3d   :  { %224 = vmatpush.msra.mxu2 %v189_v39  ;;  %262 = vmatpush.msra.mxu3 %v233_v52 }
  0x3f   :  { %263 = vmatpush.msra.mxu3 %v232_v57 }
  0x41   :  { %264 = vmatpush.msra.mxu3 %v231_v58 }
  0x43   :  { %265 = vmatpush.msra.mxu3 %v230_v59 }
  0x99   :  { %v144_v34 = vpop.f32.mrf.mxu0 }
  0x9a   :  { %v145_v35 = vadd.f32 %v319_v33, %v144_v34 }
  0x9c   :  { %v147_v36 = vmax.f32 %v145_v35, 0.0 }
  0x9e   :  { %184 = vmatmul.f32.vlgmr.msra.gmra.mxu1 %v147_v36 }
 0x11b   :  { %v185_v54 = vpop.f32.mrf.mxu1 }
 0x11c   :  { %v186_v55 = vadd.f32 %v320_v53, %v185_v54 }
 0x11e   :  { %v188_v56 = vmax.f32 %v186_v55, 0.0 }
 0x120   :  { %225 = vmatmul.f32.vlgmr.msra.gmra.mxu2 %v188_v56 }
 0x1a3   :  { %v226_v61 = vpop.f32.mrf.mxu2 }
 0x1a4   :  { %v227_v62 = vadd.f32 %v321_v60, %v226_v61 }
 0x1a6   :  { %v229_v63 = vmax.f32 %v227_v62, 0.0 }
 0x1a8   :  { %266 = vmatmul.f32.vlgmr.msra.gmra.mxu3 %v229_v63 }
 0x22b   :  { %v267_v1 = vpop.f32.mrf.mxu3 }
 0x22c   :  { %v268_v2 = vadd.f32 %v322_v0, %v267_v1 }
 0x22e   :  { %v270_v4 = vmax.f32 %v268_v2, 0.0 }
 0x230   :  { %v275_v5 = vmul.f32 %v323_v3, %v270_v4 }
 0x232   :  { %276 = vadd.xlane.f32.xlu0 %v275_v5 }
 0x2a5   :  { %v277_v7 = vpop.xlane.xlu0 %276 }
 0x2a6   :  { %v282_v8 = vadd.f32 %v324_v6, %v277_v7 }
 0x2a8   :  { %v283_v9 = vsub.f32 0.0, %v282_v8 }
 0x2aa   :  { %v284_v10 = vmul.f32 1.442695, %v283_v9 }
 0x2ac   :  { %325 = vpow2.f32 %v284_v10 }
 0x2b2   :  { %v326_v11 = vpop.eup %325 }
 0x2b3   :  { %v286_v12 = vadd.f32 1.0, %v326_v11 }
 0x2b5   :  { %327 = vrcp.f32 %v286_v12  ;;  %v298_v16 = vand.u32 2147483648, %v286_v12  ;;  %v296_v18 = vand.u32 2147483647, %v286_v12  ;;  %vm292_vm2 = vweird.f32 %v286_v12 }
 0x2b7   :  { %v299_v20 = vor.u32 1.1754944e-38, %v298_v16  ;;  %vm297_vm5 = vcmp.eq.f32.partialorder %v296_v18, 8.507059e+37 }
 0x2bb   :  { %v328_v13 = vpop.eup %327 }
 0x2bc   :  { %v288_v14 = vmul.f32 %v328_v13, %v286_v12  ;;  %vm293_vm1 = vweird.f32 %v328_v13 }
 0x2bd   :  { %vm294_vm3 = vmor %vm292_vm2, %vm293_vm1 }
 0x2be   :  { %v289_v15 = vsub.f32 1.0, %v288_v14 }
 0x2c0   :  { %v290_v17 = vmul.f32 %v328_v13, %v289_v15 }
 0x2c2   :  { %v291_v19 = vadd.f32 %v328_v13, %v290_v17 }
 0x2c4   :  { %v295_v21 = vsel %vm294_vm3, %v328_v13, %v291_v19 }
 0x2c5   :  { %v300_v22 = vsel %vm297_vm5, %v299_v20, %v295_v21 }
 0x2c6   :  { %303 = vst.msk [vmem:[%s569_s11] sm:$0xff] %vm302_vm4, %v300_v22 }
 0x2c7   :  { %308 = vsyncpa [#allocation4], 1 }
 0x2c8   :  { %309 = vsyncpa [#allocation6], 1 }
 0x2c9   :  { %310 = vsyncpa [#allocation9], 1 }

</bundles_post_ra>
